<compile_context>
chip_gen: v7x
topology: tpu7x:2x2x1
jax: 0.10.0
libtpu: 0.0.40
codegen_flags: <defaults>
</compile_context>

<pallas_src>
import functools

import jax
import jax.numpy as jnp
from jax.experimental import pallas as pl
from jax.experimental.pallas import tpu as pltpu

LANE = 128  # TPU vreg lane width


def _round_up(n, m):
    return ((n + m - 1) // m) * m


def _cdiv(a, b):
    return (a + b - 1) // b


def dqn_kernel(x_ref, w1_ref, b1_ref, w2_ref, b2_ref, w3_ref, b3_ref, o_ref):
    # In-kernel bf16 cast of x (VPU work hidden under DMA/MXU).
    xb = x_ref[...].astype(jnp.bfloat16)
    # Layer 1: Linear + ReLU. bf16 MXU matmul, f32 accumulation + epilogue.
    h1 = jnp.dot(xb, w1_ref[...], preferred_element_type=jnp.float32)
    h1 = jnp.maximum(h1 + b1_ref[...], 0.0)
    # Layer 2: Linear + ReLU (lane-padded to 128 output columns; pads stay 0).
    h2 = jnp.dot(h1.astype(jnp.bfloat16), w2_ref[...],
                 preferred_element_type=jnp.float32)
    h2 = jnp.maximum(h2 + b2_ref[...], 0.0)
    # Layer 3: Linear (Q-values, no activation), lane-padded output.
    out = jnp.dot(h2.astype(jnp.bfloat16), w3_ref[...],
                  preferred_element_type=jnp.float32)
    # bf16 store, full 128-lane unmasked vst.
    o_ref[...] = (out + b3_ref[...]).astype(o_ref.dtype)


def prepare_params(params):
    """One-time parameter preparation: lane-pad layers 2/3 and cast matmul
    operands to bf16.  Call once and reuse the result across forward calls.

    params: (w1[in,128], b1[1,128], w2[128,64], b2[1,64], w3[64,out], b3[1,out])
    returns: (weights_tuple, out_dim)
    """
    w1, b1, w2, b2, w3, b3 = params
    h1_dim = w1.shape[1]          # 128
    h2_dim = w2.shape[1]          # 64
    out_dim = w3.shape[1]

    h2_pad = _round_up(h2_dim, LANE)
    out_pad = _round_up(out_dim, LANE)
    w2p = jnp.zeros((h1_dim, h2_pad), w2.dtype).at[:, :h2_dim].set(w2)
    b2p = jnp.zeros((1, h2_pad), b2.dtype).at[:, :h2_dim].set(b2)
    w3p = jnp.zeros((h2_pad, out_pad), w3.dtype).at[:h2_dim, :out_dim].set(w3)
    b3p = jnp.zeros((1, out_pad), b3.dtype).at[:, :out_dim].set(b3)

    weights = (
        w1.astype(jnp.bfloat16),   # MXU operand
        b1.astype(jnp.float32),    # f32 epilogue
        w2p.astype(jnp.bfloat16),
        b2p.astype(jnp.float32),
        w3p.astype(jnp.bfloat16),
        b3p.astype(jnp.float32),
    )
    return weights, int(out_dim)


@functools.partial(jax.jit, static_argnames=("out_dim", "tb"))
def dqn_forward(x, weights, *, out_dim, tb=4096):
    """Run the DQN MLP forward pass with a batch-tiled Pallas kernel.

    x: [B, input_dim] float32
    weights: output of prepare_params()[0]
    returns: [B, out_dim] float32
    """
    w1b, b1, w2b, b2p, w3b, b3p = weights
    B, in_dim = x.shape
    h1_dim = w1b.shape[1]
    h2_pad = w2b.shape[1]
    out_pad = w3b.shape[1]

    # Balanced batch tile: big enough to amortize ~0.35us/step overhead,
    # sized so the last tile carries <8 rows of padding.
    n_tiles = max(1, _cdiv(B, tb))
    TB = _round_up(_cdiv(B, n_tiles), 8)
    B_pad = _round_up(B, TB)
    if B_pad != B:
        x = jnp.pad(x, ((0, B_pad - B), (0, 0)))

    out = pl.pallas_call(
        dqn_kernel,
        out_shape=jax.ShapeDtypeStruct((B_pad, out_pad), jnp.bfloat16),
        grid=(B_pad // TB,),
        in_specs=[
            pl.BlockSpec((TB, in_dim), lambda i: (i, 0)),        # x tile (f32)
            pl.BlockSpec((in_dim, h1_dim), lambda i: (0, 0)),    # W1 (resident)
            pl.BlockSpec((1, h1_dim), lambda i: (0, 0)),         # b1
            pl.BlockSpec((h1_dim, h2_pad), lambda i: (0, 0)),    # W2 (padded)
            pl.BlockSpec((1, h2_pad), lambda i: (0, 0)),         # b2
            pl.BlockSpec((h2_pad, out_pad), lambda i: (0, 0)),   # W3 (padded)
            pl.BlockSpec((1, out_pad), lambda i: (0, 0)),        # b3
        ],
        out_specs=pl.BlockSpec((TB, out_pad), lambda i: (i, 0)),
        compiler_params=pltpu.CompilerParams(
            # On v7x use pltpu.CORE_PARALLEL here to shard the batch grid
            # across both TensorCores.
            dimension_semantics=("parallel",),
        ),
    )(x, w1b, b1, w2b, b2p, w3b, b3p)

    # Single fused epilogue pass under jit: slice to real rows/cols + upcast.
    return out[:B, :out_dim].astype(jnp.float32)


def init_params(key, input_dim, output_dim):
    """Deterministic init matching the PyTorch module's shapes.

    PyTorch Linear weight is (out, in); we store the transpose (in, out) so the
    kernel computes y = x @ W + b directly.
    """
    dims = [(input_dim, 128), (128, 64), (64, output_dim)]
    params = []
    for d_in, d_out in dims:
        kw, kb, key = jax.random.split(key, 3)
        bound = 1.0 / jnp.sqrt(d_in)  # PyTorch default uniform(-1/sqrt(in), 1/sqrt(in))
        w = jax.random.uniform(kw, (d_in, d_out), jnp.float32, -bound, bound)
        b = jax.random.uniform(kb, (1, d_out), jnp.float32, -bound, bound)
        params += [w, b]
    return params


def _ref_forward(x, params):
    """Pure-JAX reference mirroring the kernel's bf16-input / f32-accumulate /
    bf16-output math."""
    w1, b1, w2, b2, w3, b3 = params
    bf = lambda a: a.astype(jnp.bfloat16).astype(jnp.float32)
    h1 = jnp.maximum(bf(x) @ bf(w1) + b1, 0.0)
    h2 = jnp.maximum(bf(h1) @ bf(w2) + b2, 0.0)
    y = bf(h2) @ bf(w3) + b3
    return y.astype(jnp.bfloat16).astype(jnp.float32)


if __name__ == "__main__":
    key = jax.random.PRNGKey(0)
    key_x, key_p = jax.random.split(key)

    batch = 8
    input_dim = 32
    output_dim = 8

    x = jax.random.normal(key_x, (batch, input_dim), jnp.float32)
    params = init_params(key_p, input_dim, output_dim)

    weights, out_dim = prepare_params(params)
    out = dqn_forward(x, weights, out_dim=out_dim)
    out = jax.block_until_ready(out)

    ref = _ref_forward(x, params)
    assert out.shape == (batch, output_dim)
    assert jnp.allclose(out, ref, atol=2e-2, rtol=2e-2), (
        float(jnp.max(jnp.abs(out - ref))))

    print("KERNEL_OK")
</pallas_src>

<mosaic_0001>
module attributes {stable_mosaic.version = 11 : i64} {
  func.func @dqn_kernel(%arg0: i32, %arg1: memref<8x32xf32, #tpu.memory_space<vmem>>, %arg2: memref<32x128xbf16, #tpu.memory_space<vmem>>, %arg3: memref<1x128xf32, #tpu.memory_space<vmem>>, %arg4: memref<128x128xbf16, #tpu.memory_space<vmem>>, %arg5: memref<1x128xf32, #tpu.memory_space<vmem>>, %arg6: memref<128x128xbf16, #tpu.memory_space<vmem>>, %arg7: memref<1x128xf32, #tpu.memory_space<vmem>>, %arg8: memref<8x128xbf16, #tpu.memory_space<vmem>>) attributes {dimension_semantics = [#tpu.dimension_semantics<parallel>], iteration_bounds = array<i64: 1>, scalar_prefetch = 0 : i64, scratch_operands = 0 : i64, tpu.core_type = #tpu.core_type<tc>, window_params = [{transform_indices = @transform_0, window_bounds = array<i64: 8, 32>}, {pipeline_mode = #tpu.pipeline_mode<synchronous>, transform_indices = @transform_1, window_bounds = array<i64: 32, 128>}, {pipeline_mode = #tpu.pipeline_mode<synchronous>, transform_indices = @transform_2, window_bounds = array<i64: 1, 128>}, {pipeline_mode = #tpu.pipeline_mode<synchronous>, transform_indices = @transform_3, window_bounds = array<i64: 128, 128>}, {pipeline_mode = #tpu.pipeline_mode<synchronous>, transform_indices = @transform_4, window_bounds = array<i64: 1, 128>}, {pipeline_mode = #tpu.pipeline_mode<synchronous>, transform_indices = @transform_5, window_bounds = array<i64: 128, 128>}, {pipeline_mode = #tpu.pipeline_mode<synchronous>, transform_indices = @transform_6, window_bounds = array<i64: 1, 128>}, {transform_indices = @transform_7, window_bounds = array<i64: 8, 128>}]} {
    %c0 = arith.constant 0 : index
    %c0_0 = arith.constant 0 : index
    %0 = vector.load %arg1[%c0, %c0_0] : memref<8x32xf32, #tpu.memory_space<vmem>>, vector<8x32xf32>
    %1 = arith.truncf %0 : vector<8x32xf32> to vector<8x32xbf16>
    %c0_1 = arith.constant 0 : index
    %c0_2 = arith.constant 0 : index
    %2 = vector.load %arg2[%c0_1, %c0_2] : memref<32x128xbf16, #tpu.memory_space<vmem>>, vector<32x128xbf16>
    %cst = arith.constant dense<0.000000e+00> : vector<8x128xf32>
    %3 = tpu.matmul %1, %2, %cst {dimension_numbers = #tpu.dot_dimension_numbers<[1], [0], [0], [1], [0, 0, 1, 1], [], []>} : vector<8x32xbf16>, vector<32x128xbf16>, vector<8x128xf32> -> vector<8x128xf32>
    %c0_3 = arith.constant 0 : index
    %c0_4 = arith.constant 0 : index
    %4 = vector.load %arg3[%c0_3, %c0_4] : memref<1x128xf32, #tpu.memory_space<vmem>>, vector<1x128xf32>
    %5 = vector.broadcast %4 : vector<1x128xf32> to vector<8x128xf32>
    %6 = arith.addf %3, %5 : vector<8x128xf32>
    %cst_5 = arith.constant 0.000000e+00 : f32
    %7 = vector.broadcast %cst_5 : f32 to vector<8x128xf32>
    %8 = arith.maximumf %6, %7 : vector<8x128xf32>
    %9 = arith.truncf %8 : vector<8x128xf32> to vector<8x128xbf16>
    %c0_6 = arith.constant 0 : index
    %c0_7 = arith.constant 0 : index
    %10 = vector.load %arg4[%c0_6, %c0_7] : memref<128x128xbf16, #tpu.memory_space<vmem>>, vector<128x128xbf16>
    %cst_8 = arith.constant dense<0.000000e+00> : vector<8x128xf32>
    %11 = tpu.matmul %9, %10, %cst_8 {dimension_numbers = #tpu.dot_dimension_numbers<[1], [0], [0], [1], [0, 0, 1, 1], [], []>} : vector<8x128xbf16>, vector<128x128xbf16>, vector<8x128xf32> -> vector<8x128xf32>
    %c0_9 = arith.constant 0 : index
    %c0_10 = arith.constant 0 : index
    %12 = vector.load %arg5[%c0_9, %c0_10] : memref<1x128xf32, #tpu.memory_space<vmem>>, vector<1x128xf32>
    %13 = vector.broadcast %12 : vector<1x128xf32> to vector<8x128xf32>
    %14 = arith.addf %11, %13 : vector<8x128xf32>
    %cst_11 = arith.constant 0.000000e+00 : f32
    %15 = vector.broadcast %cst_11 : f32 to vector<8x128xf32>
    %16 = arith.maximumf %14, %15 : vector<8x128xf32>
    %17 = arith.truncf %16 : vector<8x128xf32> to vector<8x128xbf16>
    %c0_12 = arith.constant 0 : index
    %c0_13 = arith.constant 0 : index
    %18 = vector.load %arg6[%c0_12, %c0_13] : memref<128x128xbf16, #tpu.memory_space<vmem>>, vector<128x128xbf16>
    %cst_14 = arith.constant dense<0.000000e+00> : vector<8x128xf32>
    %19 = tpu.matmul %17, %18, %cst_14 {dimension_numbers = #tpu.dot_dimension_numbers<[1], [0], [0], [1], [0, 0, 1, 1], [], []>} : vector<8x128xbf16>, vector<128x128xbf16>, vector<8x128xf32> -> vector<8x128xf32>
    %c0_15 = arith.constant 0 : index
    %c0_16 = arith.constant 0 : index
    %20 = vector.load %arg7[%c0_15, %c0_16] : memref<1x128xf32, #tpu.memory_space<vmem>>, vector<1x128xf32>
    %21 = vector.broadcast %20 : vector<1x128xf32> to vector<8x128xf32>
    %22 = arith.addf %19, %21 : vector<8x128xf32>
    %23 = arith.truncf %22 : vector<8x128xf32> to vector<8x128xbf16>
    %c0_17 = arith.constant 0 : index
    %c0_18 = arith.constant 0 : index
    %24 = vector.load %arg8[%c0_17, %c0_18] : memref<8x128xbf16, #tpu.memory_space<vmem>>, vector<8x128xbf16>
    tpu.vector_store %arg8[%c0_17, %c0_18], %23 {strides = array<i32>} : memref<8x128xbf16, #tpu.memory_space<vmem>>, vector<8x128xbf16>,
    return
  }
  func.func @transform_0(%arg0: i32) -> (i32, i32) {
    %c0_i32 = arith.constant 0 : i32
    %c0_i32_0 = arith.constant 0 : i32
    return %arg0, %c0_i32 : i32, i32
  }
  func.func @transform_1(%arg0: i32) -> (i32, i32) {
    %c0_i32 = arith.constant 0 : i32
    %c0_i32_0 = arith.constant 0 : i32
    %c0_i32_1 = arith.constant 0 : i32
    return %c0_i32, %c0_i32_0 : i32, i32
  }
  func.func @transform_2(%arg0: i32) -> (i32, i32) {
    %c0_i32 = arith.constant 0 : i32
    %c0_i32_0 = arith.constant 0 : i32
    %c0_i32_1 = arith.constant 0 : i32
    return %c0_i32, %c0_i32_0 : i32, i32
  }
  func.func @transform_3(%arg0: i32) -> (i32, i32) {
    %c0_i32 = arith.constant 0 : i32
    %c0_i32_0 = arith.constant 0 : i32
    %c0_i32_1 = arith.constant 0 : i32
    return %c0_i32, %c0_i32_0 : i32, i32
  }
  func.func @transform_4(%arg0: i32) -> (i32, i32) {
    %c0_i32 = arith.constant 0 : i32
    %c0_i32_0 = arith.constant 0 : i32
    %c0_i32_1 = arith.constant 0 : i32
    return %c0_i32, %c0_i32_0 : i32, i32
  }
  func.func @transform_5(%arg0: i32) -> (i32, i32) {
    %c0_i32 = arith.constant 0 : i32
    %c0_i32_0 = arith.constant 0 : i32
    %c0_i32_1 = arith.constant 0 : i32
    return %c0_i32, %c0_i32_0 : i32, i32
  }
  func.func @transform_6(%arg0: i32) -> (i32, i32) {
    %c0_i32 = arith.constant 0 : i32
    %c0_i32_0 = arith.constant 0 : i32
    %c0_i32_1 = arith.constant 0 : i32
    return %c0_i32, %c0_i32_0 : i32, i32
  }
  func.func @transform_7(%arg0: i32) -> (i32, i32) {
    %c0_i32 = arith.constant 0 : i32
    %c0_i32_0 = arith.constant 0 : i32
    return %arg0, %c0_i32 : i32, i32
  }
}

</mosaic_0001>

<bundles_post_ra>
// kernel: dqn_forward.1
= control target key start
LH: loop header
LB: loop body
LE: loop exit
PB: predicated region body
PF: predicated region fallthrough
CT: control target
= control target key end

     0   :  { %12 = vsyncpa [#allocation3], 0  ;;  %s736_s0 = inlined_call_operand.hbm [shape: f32[8,32], index: 0, kind: input, shape index: {}]   ;;  %s737_s1 = inlined_call_operand.hbm [shape: bf16[32,128], index: 1, kind: input, shape index: {}]   ;;  %s738_s2 = inlined_call_operand.vmem [shape: f32[1,128], index: 2, kind: input, shape index: {}]   ;;  %s739_s3 = inlined_call_operand.hbm [shape: bf16[128,128], index: 3, kind: input, shape index: {}]   ;;  %s740_s4 = inlined_call_operand.vmem [shape: f32[1,128], index: 4, kind: input, shape index: {}]   ;;  %s741_s5 = inlined_call_operand.hbm [shape: bf16[128,128], index: 5, kind: input, shape index: {}]   ;;  %s742_s6 = inlined_call_operand.vmem [shape: f32[1,128], index: 6, kind: input, shape index: {}]   ;;  %s743_s7 = inlined_call_operand.vmem [shape: bf16[8,128], index: 7, kind: output, shape index: {}]  }
   0x1   :  { %13 = vsyncpa [#allocation5], 0 }
   0x2   :  { %14 = vsyncpa [#allocation8], 0  ;;  %s595_s24 = smov [#allocation4]   ;;  %s501_s28 = scalar_lea.hbm %s737_s1, 256 }
   0x3   :  { %s30_s25 = sshll.u32 %s595_s24, 4  ;;  %p502_p0 = scmp.ne.s32.totalorder %s737_s1, %s501_s28  ;;  %s31_s25 = int_to_ptr.vmem [resolvable:$true] %s30_s25 }
   0x4   :  { %p505_p1 = scmp.lt.u32.totalorder %s501_s28, %s737_s1 }
   0x6   :  { %p507_p2 = pnand %p505_p1, %p502_p0 }
   0x8   :  { %510 = shalt.err (!%p507_p2)
}
   0x9   :  { %s511_s10 = scalar_lea.vmem %s31_s25, 256  ;;  %p516_p4 = scmp.lt.s32.totalorder %s31_s25, %s31_s25 }
   0xa   :  { %p512_p3 = scmp.ne.s32.totalorder %s31_s25, %s511_s10  ;;  %p517_p5 = scmp.lt.s32.totalorder %s511_s10, %s511_s10 }
   0xc   :  { %p518_p6 = por %p517_p5, %p516_p4 }
   0xe   :  { %p519_p7 = pnand %p518_p6, %p512_p3 }
  0x10   :  { %522 = shalt.err (!%p519_p7)
}
  0x11   :  { %s596_s11 = smov 64   ;;  %s597_s12 = smov 4  }
  0x12   :  { %36 = dma.hbm_to_vmem [thread:$0]  %s737_s1, 256, %s31_s25, [#allocation5], %s596_s11, %s596_s11, %s597_s12  }
  0x13   :  { %s598_s15 = smov [#allocation2]   ;;  %s599_s17 = smov [#allocation6]  }
  0x14   :  { %s21_s16 = sshll.u32 %s598_s15, 4  ;;  %s44_s18 = sshll.u32 %s599_s17, 4  ;;  %s22_s16 = int_to_ptr.vmem [resolvable:$true] %s21_s16  ;;  %s45_s18 = int_to_ptr.vmem [resolvable:$true] %s44_s18 }
  0x15   :  { %s523_s21 = scalar_lea.hbm %s736_s0, 128 }
  0x16   :  { %p524_p8 = scmp.ne.s32.totalorder %s736_s0, %s523_s21  ;;  %p527_p9 = scmp.lt.u32.totalorder %s523_s21, %s736_s0 }
  0x18   :  { %p529_p10 = pnand %p527_p9, %p524_p8 }
  0x1a   :  { %532 = shalt.err (!%p529_p10)
}
  0x1b   :  { %s533_s1 = scalar_lea.vmem %s22_s16, 128  ;;  %p538_p12 = scmp.lt.s32.totalorder %s22_s16, %s22_s16 }
  0x1c   :  { %p534_p11 = scmp.ne.s32.totalorder %s22_s16, %s533_s1  ;;  %p539_p13 = scmp.lt.s32.totalorder %s533_s1, %s533_s1 }
  0x1e   :  { %p540_p0 = por %p539_p13, %p538_p12 }
  0x20   :  { %p541_p1 = pnand %p540_p0, %p534_p11 }
  0x22   :  { %544 = shalt.err (!%p541_p1)
}
  0x23   :  { %24 = dma.hbm_to_vmem [thread:$0]  %s736_s0, 128, %s22_s16, [#allocation3]  }
  0x24   :  { %s545_s30 = scalar_lea.hbm %s739_s3, 1024 }
  0x25   :  { %p546_p2 = scmp.ne.s32.totalorder %s739_s3, %s545_s30  ;;  %p549_p3 = scmp.lt.u32.totalorder %s545_s30, %s739_s3 }
  0x27   :  { %p551_p4 = pnand %p549_p3, %p546_p2 }
  0x29   :  { %554 = shalt.err (!%p551_p4)
}
  0x2a   :  { %s555_s14 = scalar_lea.vmem %s45_s18, 1024  ;;  %p560_p6 = scmp.lt.s32.totalorder %s45_s18, %s45_s18 }
  0x2b   :  { %p556_p5 = scmp.ne.s32.totalorder %s45_s18, %s555_s14  ;;  %p561_p7 = scmp.lt.s32.totalorder %s555_s14, %s555_s14 }
  0x2d   :  { %p562_p8 = por %p561_p7, %p560_p6 }
  0x2f   :  { %p563_p9 = pnand %p562_p8, %p556_p5 }
  0x31   :  { %566 = shalt.err (!%p563_p9)
}
  0x32   :  { %50 = dma.hbm_to_vmem [thread:$0]  %s739_s3, 1024, %s45_s18, [#allocation5], %s596_s11, %s596_s11, %s597_s12  }
  0x33   :  { %s600_s16 = smov [#allocation7]   ;;  %s567_s21 = scalar_lea.hbm %s741_s5, 1024 }
  0x34   :  { %s58_s17 = sshll.u32 %s600_s16, 4  ;;  %p568_p10 = scmp.ne.s32.totalorder %s741_s5, %s567_s21  ;;  %s59_s17 = int_to_ptr.vmem [resolvable:$true] %s58_s17 }
  0x35   :  { %p571_p11 = scmp.lt.u32.totalorder %s567_s21, %s741_s5 }
  0x37   :  { %p573_p12 = pnand %p571_p11, %p568_p10 }
  0x39   :  { %576 = shalt.err (!%p573_p12)
}
  0x3a   :  { %s577_s1 = scalar_lea.vmem %s59_s17, 1024  ;;  %p582_p0 = scmp.lt.s32.totalorder %s59_s17, %s59_s17 }
  0x3b   :  { %p578_p13 = scmp.ne.s32.totalorder %s59_s17, %s577_s1  ;;  %p583_p1 = scmp.lt.s32.totalorder %s577_s1, %s577_s1 }
  0x3d   :  { %p584_p2 = por %p583_p1, %p582_p0 }
  0x3f   :  { %p585_p3 = pnand %p584_p2, %p578_p13 }
  0x41   :  { %588 = shalt.err (!%p585_p3)
}
  0x42   :  { %64 = dma.hbm_to_vmem [thread:$0]  %s741_s5, 1024, %s59_s17, [#allocation8], %s596_s11, %s596_s11, %s597_s12  }
  0x43   :  { %589 = dma.done.wait [#allocation3], 128  }
  0x44   :  { %590 = vsyncadd [#allocation3], 4294967168 }
  0x45   :  { %591 = dma.done.wait [#allocation5], 1280  }
  0x46   :  { %592 = vsyncadd [#allocation5], 4294966016 }
  0x47   :  { %593 = dma.done.wait [#allocation8], 1024  }
  0x48   :  { %594 = vsyncadd [#allocation8], 4294966272  ;;  %v601_v0 = vmov 0.0   ;;  %vm602_vm0 = vmmov 0   ;;  %v483_v1 = vld [vmem:[#allocation4] sm:$0xff]   ;;  %v484_v2 = vld [vmem:[#allocation4 + $0x8] sm:$0xff]  }
  0x49   :  { %427 = vmatprep.subr.bf16.mxu0 %v601_v0  ;;  %431 = vmatprep.mubr.msk.bf16.mxu0 %vm602_vm0, %v601_v0  ;;  %v80_v3 = vld [vmem:[#allocation2] sm:$0xff]  ;;  %v485_v4 = vld [vmem:[#allocation6] sm:$0xff]   ;;  %vm105_vm1 = vcmask 261120   ;;  %v487_v7 = vld [vmem:[#allocation6 + $0x10] sm:$0xff]  }
  0x4a   :  { %435 = vmatprep.subr.bf16.mxu1 %v601_v0  ;;  %451 = vmatprep.mubr.msk.bf16.mxu1 %vm602_vm0, %v601_v0  ;;  %v81_v5 = vpack.c.bf16 %v80_v3, %v80_v3  ;;  %v486_v6 = vld [vmem:[#allocation6 + $0x8] sm:$0xff]   ;;  %v488_v8 = vld [vmem:[#allocation6 + $0x18] sm:$0xff]   ;;  %v489_v9 = vld [vmem:[#allocation6 + $0x20] sm:$0xff]  }
  0x4b   :  { %428 = vmatpush3.bf16.msra.mxu0 %v483_v1  ;;  %436 = vmatpush3.bf16.msra.mxu1 %v485_v4  ;;  %v490_v10 = vld [vmem:[#allocation6 + $0x28] sm:$0xff]   ;;  %v491_v11 = vld [vmem:[#allocation6 + $0x30] sm:$0xff]   ;;  %v492_v12 = vld [vmem:[#allocation6 + $0x38] sm:$0xff]  }
  0x4c   :  { %429 = vmatprep.subr.bf16.mxu0 %v601_v0  ;;  %437 = vmatprep.subr.bf16.mxu1 %v601_v0  ;;  %v493_v13 = vld [vmem:[#allocation7] sm:$0xff]   ;;  %v494_v14 = vld [vmem:[#allocation7 + $0x8] sm:$0xff]   ;;  %v495_v15 = vld [vmem:[#allocation7 + $0x10] sm:$0xff]  }
  0x4d   :  { %v496_v16 = vld [vmem:[#allocation7 + $0x18] sm:$0xff]   ;;  %v497_v17 = vld [vmem:[#allocation7 + $0x20] sm:$0xff]   ;;  %v498_v18 = vld [vmem:[#allocation7 + $0x28] sm:$0xff]  }
  0x4e   :  { %v384_v19 = vld [vmem:[%s738_s2] ss:$0 sm:$0xff]  ;;  %v499_v27 = vld [vmem:[#allocation7 + $0x30] sm:$0xff]   ;;  %v500_v28 = vld [vmem:[#allocation7 + $0x38] sm:$0xff]  }
  0x4f   :  { %430 = vmatpush3.bf16.msra.mxu0 %v484_v2  ;;  %438 = vmatpush3.bf16.msra.mxu1 %v486_v6  ;;  %v388_v29 = vld [vmem:[%s740_s4] ss:$0 sm:$0xff] }
  0x50   :  { %455 = vmatprep.subr.bf16.mxu0 %v601_v0  ;;  %439 = vmatprep.subr.bf16.mxu1 %v601_v0  ;;  %v397_v37 = vld [vmem:[%s742_s6] ss:$0 sm:$0xff] }
  0x52   :  { %432 = vmatmul.mubr.msk.bf16.vlgmr.msra.gmra.mrb[0].mxu0 %vm105_vm1, %v81_v5 }
  0x53   :  { %471 = vmatprep.mubr.msk.bf16.mxu0 %vm602_vm0, %v601_v0  ;;  %440 = vmatpush3.bf16.msra.mxu1 %v487_v7 }
  0x54   :  { %441 = vmatprep.subr.bf16.mxu1 %v601_v0  ;;  %456 = vmatpush3.bf16.msra.mxu0 %v493_v13 }
  0x55   :  { %457 = vmatprep.subr.bf16.mxu0 %v601_v0 }
  0x57   :  { %442 = vmatpush3.bf16.msra.mxu1 %v488_v8 }
  0x58   :  { %443 = vmatprep.subr.bf16.mxu1 %v601_v0  ;;  %458 = vmatpush3.bf16.msra.mxu0 %v494_v14 }
  0x59   :  { %459 = vmatprep.subr.bf16.mxu0 %v601_v0 }
  0x5b   :  { %444 = vmatpush3.bf16.msra.mxu1 %v489_v9 }
  0x5c   :  { %445 = vmatprep.subr.bf16.mxu1 %v601_v0  ;;  %460 = vmatpush3.bf16.msra.mxu0 %v495_v15 }
  0x5d   :  { %461 = vmatprep.subr.bf16.mxu0 %v601_v0 }
  0x5f   :  { %446 = vmatpush3.bf16.msra.mxu1 %v490_v10 }
  0x60   :  { %447 = vmatprep.subr.bf16.mxu1 %v601_v0  ;;  %462 = vmatpush3.bf16.msra.mxu0 %v496_v16 }
  0x61   :  { %463 = vmatprep.subr.bf16.mxu0 %v601_v0 }
  0x63   :  { %448 = vmatpush3.bf16.msra.mxu1 %v491_v11 }
  0x64   :  { %449 = vmatprep.subr.bf16.mxu1 %v601_v0  ;;  %464 = vmatpush3.bf16.msra.mxu0 %v497_v17 }
  0x65   :  { %465 = vmatprep.subr.bf16.mxu0 %v601_v0 }
  0x67   :  { %450 = vmatpush3.bf16.msra.mxu1 %v492_v12 }
  0x68   :  { %466 = vmatpush3.bf16.msra.mxu0 %v498_v18 }
  0x69   :  { %467 = vmatprep.subr.bf16.mxu0 %v601_v0 }
  0x6c   :  { %468 = vmatpush3.bf16.msra.mxu0 %v499_v27 }
  0x6d   :  { %469 = vmatprep.subr.bf16.mxu0 %v601_v0 }
  0x70   :  { %470 = vmatpush3.bf16.msra.mxu0 %v500_v28 }
 0x125   :  { %v143_v20 = vpop.f32.mrb[0].mxu0 }
 0x126   :  { %v144_v21 = vadd.f32 %v384_v19, %v143_v20  ;;  %v433_v22 = vpop.f32.mrb[1].mxu0 }
 0x127   :  { %v146_v23 = vpop.f32.mrb[2].mxu0 }
 0x128   :  { %v149_v24 = vmax.f32 %v144_v21, 0.0  ;;  %v434_v25 = vpop.f32.mrb[3].mxu0 }
 0x12a   :  { %v150_v26 = vpack.c.bf16 %v149_v24, %v149_v24 }
 0x12c   :  { %452 = vmatmul.mubr.bf16.vlgmr.msra.gmra.mrb[0].mxu1 %v150_v26 }
 0x1ff   :  { %v256_v30 = vpop.f32.mrb[0].mxu1 }
 0x200   :  { %v257_v31 = vadd.f32 %v388_v29, %v256_v30  ;;  %v453_v32 = vpop.f32.mrb[1].mxu1 }
 0x201   :  { %v259_v33 = vpop.f32.mrb[2].mxu1 }
 0x202   :  { %v262_v34 = vmax.f32 %v257_v31, 0.0  ;;  %v454_v35 = vpop.f32.mrb[3].mxu1 }
 0x204   :  { %v263_v36 = vpack.c.bf16 %v262_v34, %v262_v34 }
 0x206   :  { %472 = vmatmul.mubr.bf16.vlgmr.msra.gmra.mrb[4].mxu0 %v263_v36 }
 0x2d9   :  { %v369_v38 = vpop.f32.mrb[4].mxu0 }
 0x2da   :  { %v370_v39 = vadd.f32 %v397_v37, %v369_v38  ;;  %v473_v40 = vpop.f32.mrb[5].mxu0 }
 0x2db   :  { %v372_v41 = vpop.f32.mrb[6].mxu0 }
 0x2dc   :  { %v375_v42 = vpack.c.bf16 %v370_v39, %v370_v39  ;;  %v474_v43 = vpop.f32.mrb[7].mxu0 }
 0x2de   :  { %376 = vst [vmem:[%s743_s7] sm:$0xf] %v375_v42 }
 0x2df   :  { %381 = vsyncpa [#allocation3], 1 }
 0x2e0   :  { %382 = vsyncpa [#allocation5], 1 }
 0x2e1   :  { %383 = vsyncpa [#allocation8], 1 }

</bundles_post_ra>
